<compile_context>
chip_gen: v5e
topology: v5e:2x2
jax: 0.10.0
libtpu: 0.0.40
codegen_flags: <defaults>
</compile_context>

<pallas_src>
import functools

import jax
import jax.numpy as jnp
from jax import lax
from jax.experimental import pallas as pl
from jax.experimental.pallas import tpu as pltpu

EPS = 1e-5


def _pack_plane_weights(weight):
    """Pack ConvTranspose2d weights (Cin, Cout, 4, 4) into W9 (4*Cout, 9*Cin).

    With xpad the 1-pixel zero-padded input,
        y[p*Cout + oc, m*W + n]
          = sum_{sh,sw,ic} W9[p*Cout+oc, (3*sh+sw)*Cin+ic] * xpad[ic, m+sh, n+sw]
    equals the transposed-conv output at pixel (2m+ph, 2n+pw), p = 2*ph + pw.
    Shift combinations a plane does not use stay zero.
    """
    Cin, Cout = weight.shape[0], weight.shape[1]
    w9 = jnp.zeros((4 * Cout, 9 * Cin), jnp.float32)
    for ph in range(2):
        for pw in range(2):
            p = 2 * ph + pw
            for dr in range(2):
                for dc in range(2):
                    sh, sw = ph + dr, pw + dc
                    kh, kw = 3 - ph - 2 * dr, 3 - pw - 2 * dc
                    blk = weight[:, :, kh, kw].astype(jnp.float32).T  # (Cout, Cin)
                    col = (3 * sh + sw) * Cin
                    w9 = w9.at[p * Cout:(p + 1) * Cout, col:col + Cin].set(blk)
    return w9.astype(jnp.bfloat16)


def _upsample_kernel(x_ref, w_ref, o_ref, rhs_ref, *, H, W):
    # x_ref  : (1, Cin, H*W)     f32  flattened NCHW input, one batch element
    # w_ref  : (4*Cout, 9*Cin)   bf16 packed per-plane / per-shift weights
    # o_ref  : (1, 4, Cout, H*W) bf16 parity-plane output, p = 2*ph + pw
    # rhs_ref: (9*Cin, H*W)      bf16 scratch: lane-dense im2col RHS
    Cin = x_ref.shape[1]
    HW = H * W
    Cout = o_ref.shape[2]

    xf = x_ref[0]                                         # (Cin, HW) f32

    # Boundary masks, computed once and reused for all nine shifts.
    idx = lax.broadcasted_iota(jnp.int32, (Cin, HW), 1)   # flat index m*W + n
    col = idx % W
    row_ok = {-1: idx >= W, 0: None, 1: idx <= HW - W - 1}  # 0 <= m+dr < H
    col_ok = {-1: col >= 1, 0: None, 1: col <= W - 2}        # 0 <= n+dc < W

    # Nine shifted zero-padded views via lane rotation (XLU) + mask (VPU),
    # stored lane-dense into the (9*Cin, HW) RHS scratch.  view[i] = x[i + s]
    # at valid positions, 0 at the padded border.
    for dr in (-1, 0, 1):
        for dc in (-1, 0, 1):
            s = dr * W + dc
            v = xf if s == 0 else pltpu.roll(xf, (-s) % HW, axis=1)
            masks = [mm for mm in (row_ok[dr], col_ok[dc]) if mm is not None]
            if len(masks) == 2:
                v = jnp.where(jnp.logical_and(masks[0], masks[1]), v, 0.0)
            elif len(masks) == 1:
                v = jnp.where(masks[0], v, 0.0)
            blk = 3 * (dr + 1) + (dc + 1)      # matches _pack_plane_weights
            rhs_ref[blk * Cin:(blk + 1) * Cin, :] = v.astype(jnp.bfloat16)

    # All four parity planes in a single bf16 MXU matmul, f32 accumulation.
    y = jnp.dot(w_ref[...], rhs_ref[...],
                preferred_element_type=jnp.float32)        # (4*Cout, HW)
    ys = y.reshape(4, Cout, HW)

    # InstanceNorm2d(affine=False) over the full 2H x 2W output (= all four
    # planes).  Single-pass sum / sum-of-squares statistics (no extra centred
    # full-size temporary).  The ConvTranspose2d bias is omitted: it is
    # exactly cancelled by this normalization.
    inv_n = 1.0 / (4.0 * HW)
    s1 = jnp.sum(jnp.sum(ys, axis=2, keepdims=True), axis=0, keepdims=True)
    s2 = jnp.sum(jnp.sum(ys * ys, axis=2, keepdims=True), axis=0, keepdims=True)
    mean = s1 * inv_n                                      # (1, Cout, 1)
    var = jnp.maximum(s2 * inv_n - mean * mean, 0.0)
    scale = lax.rsqrt(var + EPS)
    o_ref[0] = jnp.maximum((ys - mean) * scale, 0.0).astype(o_ref.dtype)

    # TODO(synk): nn.Dropout2d(0.5) training-mode behaviour (stochastic
    # per-channel zeroing + 2x rescale) is not implemented; eval-mode
    # identity semantics are used.


@functools.partial(jax.jit, static_argnames=("has_shortcut",))
def _upsample_jit(x_nchw, weight, shortcut, has_shortcut):
    B, Cin, H, W = x_nchw.shape
    Cout = weight.shape[1]
    HW = H * W

    w9 = _pack_plane_weights(weight)                       # (4*Cout, 9*Cin)
    x_flat = x_nchw.astype(jnp.float32).reshape(B, Cin, HW)  # free collapse

    kernel = functools.partial(_upsample_kernel, H=H, W=W)

    # Per-step VMEM estimate (double-buffered I/O + scratch + f32 temps) with
    # headroom; set explicitly since v5e's default scoped limit is only 16 MiB.
    vmem_need = (2 * Cin * HW * 4                 # input blocks (f32, x2)
                 + 2 * 4 * Cout * 9 * Cin * 2     # weight blocks (bf16, x2)
                 + 2 * 4 * Cout * HW * 2          # output blocks (bf16, x2)
                 + 9 * Cin * HW * 2               # im2col RHS scratch (bf16)
                 + 4 * 4 * Cout * HW * 4)         # f32 matmul result + temps
    vmem_limit = int(min(max(2 * vmem_need, 32 * 1024 * 1024),
                         112 * 1024 * 1024))

    out = pl.pallas_call(
        kernel,
        out_shape=jax.ShapeDtypeStruct((B, 4, Cout, HW), jnp.bfloat16),
        grid=(B,),
        in_specs=[
            pl.BlockSpec((1, Cin, HW), lambda b: (b, 0, 0)),
            pl.BlockSpec((4 * Cout, 9 * Cin), lambda b: (0, 0)),
        ],
        out_specs=pl.BlockSpec((1, 4, Cout, HW), lambda b: (b, 0, 0, 0)),
        scratch_shapes=[pltpu.VMEM((9 * Cin, HW), jnp.bfloat16)],
        compiler_params=pltpu.CompilerParams(
            dimension_semantics=("parallel",),
            vmem_limit_bytes=vmem_limit),
    )(x_flat, w9)

    # Interleave parity planes -> NCHW (B, Cout, 2H, 2W) in one bf16 XLA copy.
    y = out.reshape(B, 2, 2, Cout, H, W)
    y = y.transpose(0, 3, 4, 1, 5, 2).reshape(B, Cout, 2 * H, 2 * W)
    if has_shortcut:
        return jnp.concatenate([y.astype(shortcut.dtype), shortcut], axis=1)
    return y.astype(jnp.float32)


def upsample(x_nchw, weight, bias, shortcut=None):
    """Forward pass of `Upsample`.  x: NCHW, weight: (Cin, Cout, 4, 4).

    `bias` is accepted for API parity but unused: InstanceNorm2d(affine=False)
    exactly cancels any per-channel constant shift (this is only valid while
    the norm immediately follows the transposed convolution).
    """
    del bias
    if shortcut is None:
        dummy = jnp.zeros((x_nchw.shape[0], 0,
                           2 * x_nchw.shape[2], 2 * x_nchw.shape[3]),
                          jnp.float32)
        return _upsample_jit(x_nchw, weight, dummy, False)
    return _upsample_jit(x_nchw, weight, shortcut, True)


def _reference(x_nchw, weight, bias, shortcut=None):
    """Pure-JAX reference (conv-transpose via lhs-dilated conv + inst-norm + relu)."""
    w_conv = jnp.flip(weight, axis=(2, 3)).transpose(1, 0, 2, 3)  # (Cout,Cin,kh,kw)
    y = lax.conv_general_dilated(
        x_nchw, w_conv, window_strides=(1, 1),
        padding=((2, 2), (2, 2)), lhs_dilation=(2, 2),
        dimension_numbers=("NCHW", "OIHW", "NCHW"),
        precision=lax.Precision.HIGHEST)
    y = y + bias[None, :, None, None]
    mean = y.mean(axis=(2, 3), keepdims=True)
    var = ((y - mean) ** 2).mean(axis=(2, 3), keepdims=True)
    y = (y - mean) / jnp.sqrt(var + EPS)
    y = jnp.maximum(y, 0.0)
    if shortcut is not None:
        y = jnp.concatenate([y, shortcut], axis=1)
    return y


if __name__ == "__main__":
    B, Cin, Cout, H, W = 2, 4, 8, 16, 16

    key = jax.random.PRNGKey(0)
    k1, k2, k3, k4 = jax.random.split(key, 4)
    x = jax.random.normal(k1, (B, Cin, H, W), jnp.float32)
    # ConvTranspose2d weight shape in PyTorch: (in_channels, out_channels, kH, kW)
    weight = jax.random.normal(k2, (Cin, Cout, 4, 4), jnp.float32) * 0.1
    bias = jax.random.normal(k3, (Cout,), jnp.float32) * 0.1
    shortcut = jax.random.normal(k4, (B, Cin, 2 * H, 2 * W), jnp.float32)

    out = upsample(x, weight, bias, shortcut=shortcut)
    out = jax.block_until_ready(out)
    assert out.shape == (B, Cout + Cin, 2 * H, 2 * W), out.shape

    ref = _reference(x, weight, bias, shortcut=shortcut)
    # bf16 MXU matmul + bf16 output store vs f32 HIGHEST-precision reference
    # -> loose tolerance.
    if not jnp.allclose(out, ref, atol=4e-2, rtol=4e-2):
        max_err = float(jnp.max(jnp.abs(out - ref)))
        raise AssertionError(f"Pallas kernel mismatch vs reference, max_err={max_err}")

    print("KERNEL_OK")
</pallas_src>

<mosaic_0001>
module attributes {stable_mosaic.version = 11 : i64} {
  func.func @_upsample_kernel(%arg0: i32, %arg1: memref<1x4x256xf32, #tpu.memory_space<vmem>>, %arg2: memref<32x36xbf16, #tpu.memory_space<vmem>>, %arg3: memref<1x4x8x256xbf16, #tpu.memory_space<vmem>>, %arg4: memref<36x256xbf16, #tpu.memory_space<vmem>>) attributes {dimension_semantics = [#tpu.dimension_semantics<parallel>], iteration_bounds = array<i64: 2>, scalar_prefetch = 0 : i64, scratch_operands = 1 : i64, tpu.core_type = #tpu.core_type<tc>, window_params = [{transform_indices = @transform_0, window_bounds = array<i64: 1, 4, 256>}, {pipeline_mode = #tpu.pipeline_mode<synchronous>, transform_indices = @transform_1, window_bounds = array<i64: 32, 36>}, {transform_indices = @transform_2, window_bounds = array<i64: 1, 4, 8, 256>}]} {
    %c0 = arith.constant 0 : index
    %c0_0 = arith.constant 0 : index
    %c0_1 = arith.constant 0 : index
    %0 = vector.load %arg1[%c0, %c0_0, %c0_1] : memref<1x4x256xf32, #tpu.memory_space<vmem>>, vector<1x4x256xf32>
    %1 = vector.shape_cast %0 : vector<1x4x256xf32> to vector<4x256xf32>
    %2 = tpu.iota {dimensions = array<i32: 1>} : vector<4x256xi32>
    %c16_i32 = arith.constant 16 : i32
    %c0_i32 = arith.constant 0 : i32
    %3 = arith.cmpi eq, %c16_i32, %c0_i32 : i32
    %c1_i32 = arith.constant 1 : i32
    %4 = arith.select %3, %c1_i32, %c16_i32 : i32
    %5 = vector.broadcast %4 : i32 to vector<4x256xi32>
    %6 = arith.remsi %2, %5 : vector<4x256xi32>
    %c0_i32_2 = arith.constant 0 : i32
    %7 = vector.broadcast %c0_i32_2 : i32 to vector<4x256xi32>
    %8 = arith.cmpi ne, %6, %7 : vector<4x256xi32>
    %c0_i32_3 = arith.constant 0 : i32
    %9 = vector.broadcast %c0_i32_3 : i32 to vector<4x256xi32>
    %10 = arith.cmpi slt, %6, %9 : vector<4x256xi32>
    %c0_i32_4 = arith.constant 0 : i32
    %11 = arith.cmpi slt, %4, %c0_i32_4 : i32
    %12 = vector.broadcast %11 : i1 to vector<4x256xi1>
    %13 = vector.broadcast %12 : vector<4x256xi1> to vector<4x256xi1>
    %14 = arith.xori %10, %13 : vector<4x256xi1>
    %15 = arith.andi %14, %8 : vector<4x256xi1>
    %16 = vector.broadcast %4 : i32 to vector<4x256xi32>
    %17 = arith.addi %6, %16 : vector<4x256xi32>
    %18 = arith.select %15, %17, %6 : vector<4x256xi1>, vector<4x256xi32>
    %c16_i32_5 = arith.constant 16 : i32
    %19 = vector.broadcast %c16_i32_5 : i32 to vector<4x256xi32>
    %20 = arith.cmpi sge, %2, %19 : vector<4x256xi32>
    %c239_i32 = arith.constant 239 : i32
    %21 = vector.broadcast %c239_i32 : i32 to vector<4x256xi32>
    %22 = arith.cmpi sle, %2, %21 : vector<4x256xi32>
    %c1_i32_6 = arith.constant 1 : i32
    %23 = vector.broadcast %c1_i32_6 : i32 to vector<4x256xi32>
    %24 = arith.cmpi sge, %18, %23 : vector<4x256xi32>
    %c14_i32 = arith.constant 14 : i32
    %25 = vector.broadcast %c14_i32 : i32 to vector<4x256xi32>
    %26 = arith.cmpi sle, %18, %25 : vector<4x256xi32>
    %c17_i32 = arith.constant 17 : i32
    %27 = tpu.dynamic_rotate %1 by %c17_i32 dim 1 : vector<4x256xf32>, i32 -> vector<4x256xf32>
    %28 = arith.andi %20, %24 : vector<4x256xi1>
    %cst = arith.constant 0.000000e+00 : f32
    %29 = vector.broadcast %cst : f32 to vector<4x256xf32>
    %30 = arith.select %28, %27, %29 : vector<4x256xi1>, vector<4x256xf32>
    %31 = arith.truncf %30 : vector<4x256xf32> to vector<4x256xbf16>
    %c0_7 = arith.constant 0 : index
    %c0_8 = arith.constant 0 : index
    %32 = vector.load %arg4[%c0_7, %c0_8] : memref<36x256xbf16, #tpu.memory_space<vmem>>, vector<4x256xbf16>
    tpu.vector_store %arg4[%c0_7, %c0_8], %31 {strides = array<i32>} : memref<36x256xbf16, #tpu.memory_space<vmem>>, vector<4x256xbf16>,
    %c16_i32_9 = arith.constant 16 : i32
    %33 = tpu.dynamic_rotate %1 by %c16_i32_9 dim 1 : vector<4x256xf32>, i32 -> vector<4x256xf32>
    %cst_10 = arith.constant 0.000000e+00 : f32
    %34 = vector.broadcast %cst_10 : f32 to vector<4x256xf32>
    %35 = arith.select %20, %33, %34 : vector<4x256xi1>, vector<4x256xf32>
    %36 = arith.truncf %35 : vector<4x256xf32> to vector<4x256xbf16>
    %c4 = arith.constant 4 : index
    %c0_11 = arith.constant 0 : index
    %37 = vector.load %arg4[%c4, %c0_11] : memref<36x256xbf16, #tpu.memory_space<vmem>>, vector<4x256xbf16>
    tpu.vector_store %arg4[%c4, %c0_11], %36 {strides = array<i32>} : memref<36x256xbf16, #tpu.memory_space<vmem>>, vector<4x256xbf16>,
    %c15_i32 = arith.constant 15 : i32
    %38 = tpu.dynamic_rotate %1 by %c15_i32 dim 1 : vector<4x256xf32>, i32 -> vector<4x256xf32>
    %39 = arith.andi %20, %26 : vector<4x256xi1>
    %cst_12 = arith.constant 0.000000e+00 : f32
    %40 = vector.broadcast %cst_12 : f32 to vector<4x256xf32>
    %41 = arith.select %39, %38, %40 : vector<4x256xi1>, vector<4x256xf32>
    %42 = arith.truncf %41 : vector<4x256xf32> to vector<4x256xbf16>
    %c8 = arith.constant 8 : index
    %c0_13 = arith.constant 0 : index
    %43 = vector.load %arg4[%c8, %c0_13] : memref<36x256xbf16, #tpu.memory_space<vmem>>, vector<4x256xbf16>
    tpu.vector_store %arg4[%c8, %c0_13], %42 {strides = array<i32>} : memref<36x256xbf16, #tpu.memory_space<vmem>>, vector<4x256xbf16>,
    %c1_i32_14 = arith.constant 1 : i32
    %44 = tpu.dynamic_rotate %1 by %c1_i32_14 dim 1 : vector<4x256xf32>, i32 -> vector<4x256xf32>
    %cst_15 = arith.constant 0.000000e+00 : f32
    %45 = vector.broadcast %cst_15 : f32 to vector<4x256xf32>
    %46 = arith.select %24, %44, %45 : vector<4x256xi1>, vector<4x256xf32>
    %47 = arith.truncf %46 : vector<4x256xf32> to vector<4x256xbf16>
    %c12 = arith.constant 12 : index
    %c0_16 = arith.constant 0 : index
    %48 = vector.load %arg4[%c12, %c0_16] : memref<36x256xbf16, #tpu.memory_space<vmem>>, vector<4x256xbf16>
    tpu.vector_store %arg4[%c12, %c0_16], %47 {strides = array<i32>} : memref<36x256xbf16, #tpu.memory_space<vmem>>, vector<4x256xbf16>,
    %49 = arith.truncf %1 : vector<4x256xf32> to vector<4x256xbf16>
    %c16 = arith.constant 16 : index
    %c0_17 = arith.constant 0 : index
    %50 = vector.load %arg4[%c16, %c0_17] : memref<36x256xbf16, #tpu.memory_space<vmem>>, vector<4x256xbf16>
    tpu.vector_store %arg4[%c16, %c0_17], %49 {strides = array<i32>} : memref<36x256xbf16, #tpu.memory_space<vmem>>, vector<4x256xbf16>,
    %c255_i32 = arith.constant 255 : i32
    %51 = tpu.dynamic_rotate %1 by %c255_i32 dim 1 : vector<4x256xf32>, i32 -> vector<4x256xf32>
    %cst_18 = arith.constant 0.000000e+00 : f32
    %52 = vector.broadcast %cst_18 : f32 to vector<4x256xf32>
    %53 = arith.select %26, %51, %52 : vector<4x256xi1>, vector<4x256xf32>
    %54 = arith.truncf %53 : vector<4x256xf32> to vector<4x256xbf16>
    %c20 = arith.constant 20 : index
    %c0_19 = arith.constant 0 : index
    %55 = vector.load %arg4[%c20, %c0_19] : memref<36x256xbf16, #tpu.memory_space<vmem>>, vector<4x256xbf16>
    tpu.vector_store %arg4[%c20, %c0_19], %54 {strides = array<i32>} : memref<36x256xbf16, #tpu.memory_space<vmem>>, vector<4x256xbf16>,
    %c241_i32 = arith.constant 241 : i32
    %56 = tpu.dynamic_rotate %1 by %c241_i32 dim 1 : vector<4x256xf32>, i32 -> vector<4x256xf32>
    %57 = arith.andi %22, %24 : vector<4x256xi1>
    %cst_20 = arith.constant 0.000000e+00 : f32
    %58 = vector.broadcast %cst_20 : f32 to vector<4x256xf32>
    %59 = arith.select %57, %56, %58 : vector<4x256xi1>, vector<4x256xf32>
    %60 = arith.truncf %59 : vector<4x256xf32> to vector<4x256xbf16>
    %c24 = arith.constant 24 : index
    %c0_21 = arith.constant 0 : index
    %61 = vector.load %arg4[%c24, %c0_21] : memref<36x256xbf16, #tpu.memory_space<vmem>>, vector<4x256xbf16>
    tpu.vector_store %arg4[%c24, %c0_21], %60 {strides = array<i32>} : memref<36x256xbf16, #tpu.memory_space<vmem>>, vector<4x256xbf16>,
    %c240_i32 = arith.constant 240 : i32
    %62 = tpu.dynamic_rotate %1 by %c240_i32 dim 1 : vector<4x256xf32>, i32 -> vector<4x256xf32>
    %cst_22 = arith.constant 0.000000e+00 : f32
    %63 = vector.broadcast %cst_22 : f32 to vector<4x256xf32>
    %64 = arith.select %22, %62, %63 : vector<4x256xi1>, vector<4x256xf32>
    %65 = arith.truncf %64 : vector<4x256xf32> to vector<4x256xbf16>
    %c28 = arith.constant 28 : index
    %c0_23 = arith.constant 0 : index
    %66 = vector.load %arg4[%c28, %c0_23] : memref<36x256xbf16, #tpu.memory_space<vmem>>, vector<4x256xbf16>
    tpu.vector_store %arg4[%c28, %c0_23], %65 {strides = array<i32>} : memref<36x256xbf16, #tpu.memory_space<vmem>>, vector<4x256xbf16>,
    %c239_i32_24 = arith.constant 239 : i32
    %67 = tpu.dynamic_rotate %1 by %c239_i32_24 dim 1 : vector<4x256xf32>, i32 -> vector<4x256xf32>
    %68 = arith.andi %22, %26 : vector<4x256xi1>
    %cst_25 = arith.constant 0.000000e+00 : f32
    %69 = vector.broadcast %cst_25 : f32 to vector<4x256xf32>
    %70 = arith.select %68, %67, %69 : vector<4x256xi1>, vector<4x256xf32>
    %71 = arith.truncf %70 : vector<4x256xf32> to vector<4x256xbf16>
    %c32 = arith.constant 32 : index
    %c0_26 = arith.constant 0 : index
    %72 = vector.load %arg4[%c32, %c0_26] : memref<36x256xbf16, #tpu.memory_space<vmem>>, vector<4x256xbf16>
    tpu.vector_store %arg4[%c32, %c0_26], %71 {strides = array<i32>} : memref<36x256xbf16, #tpu.memory_space<vmem>>, vector<4x256xbf16>,
    %c0_27 = arith.constant 0 : index
    %c0_28 = arith.constant 0 : index
    %73 = vector.load %arg2[%c0_27, %c0_28] : memref<32x36xbf16, #tpu.memory_space<vmem>>, vector<32x36xbf16>
    %c0_29 = arith.constant 0 : index
    %c0_30 = arith.constant 0 : index
    %74 = vector.load %arg4[%c0_29, %c0_30] : memref<36x256xbf16, #tpu.memory_space<vmem>>, vector<36x256xbf16>
    %cst_31 = arith.constant dense<0.000000e+00> : vector<32x256xf32>
    %75 = tpu.matmul %73, %74, %cst_31 {dimension_numbers = #tpu.dot_dimension_numbers<[1], [0], [0], [1], [0, 0, 1, 1], [], []>} : vector<32x36xbf16>, vector<36x256xbf16>, vector<32x256xf32> -> vector<32x256xf32>
    %76 = vector.shape_cast %75 : vector<32x256xf32> to vector<4x8x256xf32>
    %cst_32 = arith.constant dense<0.000000e+00> : vector<4x8xf32>
    %77 = vector.multi_reduction <add>, %76, %cst_32 [2] : vector<4x8x256xf32> to vector<4x8xf32>
    %78 = vector.shape_cast %77 : vector<4x8xf32> to vector<4x8x1xf32>
    %cst_33 = arith.constant dense<0.000000e+00> : vector<8x1xf32>
    %79 = vector.multi_reduction <add>, %78, %cst_33 [0] : vector<4x8x1xf32> to vector<8x1xf32>
    %80 = vector.shape_cast %79 : vector<8x1xf32> to vector<1x8x1xf32>
    %81 = arith.mulf %76, %76 : vector<4x8x256xf32>
    %cst_34 = arith.constant dense<0.000000e+00> : vector<4x8xf32>
    %82 = vector.multi_reduction <add>, %81, %cst_34 [2] : vector<4x8x256xf32> to vector<4x8xf32>
    %83 = vector.shape_cast %82 : vector<4x8xf32> to vector<4x8x1xf32>
    %cst_35 = arith.constant dense<0.000000e+00> : vector<8x1xf32>
    %84 = vector.multi_reduction <add>, %83, %cst_35 [0] : vector<4x8x1xf32> to vector<8x1xf32>
    %85 = vector.shape_cast %84 : vector<8x1xf32> to vector<1x8x1xf32>
    %cst_36 = arith.constant 9.765625E-4 : f32
    %86 = vector.broadcast %cst_36 : f32 to vector<1x8x1xf32>
    %87 = arith.mulf %80, %86 : vector<1x8x1xf32>
    %cst_37 = arith.constant 9.765625E-4 : f32
    %88 = vector.broadcast %cst_37 : f32 to vector<1x8x1xf32>
    %89 = arith.mulf %85, %88 : vector<1x8x1xf32>
    %90 = arith.mulf %87, %87 : vector<1x8x1xf32>
    %91 = arith.subf %89, %90 : vector<1x8x1xf32>
    %cst_38 = arith.constant 0.000000e+00 : f32
    %92 = vector.broadcast %cst_38 : f32 to vector<1x8x1xf32>
    %93 = arith.maximumf %91, %92 : vector<1x8x1xf32>
    %cst_39 = arith.constant 9.99999974E-6 : f32
    %94 = vector.broadcast %cst_39 : f32 to vector<1x8x1xf32>
    %95 = arith.addf %93, %94 : vector<1x8x1xf32>
    %96 = math.rsqrt %95 : vector<1x8x1xf32>
    %97 = vector.broadcast %87 : vector<1x8x1xf32> to vector<4x8x256xf32>
    %98 = arith.subf %76, %97 : vector<4x8x256xf32>
    %99 = vector.broadcast %96 : vector<1x8x1xf32> to vector<4x8x256xf32>
    %100 = arith.mulf %98, %99 : vector<4x8x256xf32>
    %cst_40 = arith.constant 0.000000e+00 : f32
    %101 = vector.broadcast %cst_40 : f32 to vector<4x8x256xf32>
    %102 = arith.maximumf %100, %101 : vector<4x8x256xf32>
    %103 = arith.truncf %102 : vector<4x8x256xf32> to vector<4x8x256xbf16>
    %c0_41 = arith.constant 0 : index
    %c0_42 = arith.constant 0 : index
    %c0_43 = arith.constant 0 : index
    %c0_44 = arith.constant 0 : index
    %104 = vector.load %arg3[%c0_41, %c0_42, %c0_43, %c0_44] : memref<1x4x8x256xbf16, #tpu.memory_space<vmem>>, vector<1x4x8x256xbf16>
    %105 = vector.shape_cast %104 : vector<1x4x8x256xbf16> to vector<4x8x256xbf16>
    %106 = vector.shape_cast %103 : vector<4x8x256xbf16> to vector<1x4x8x256xbf16>
    tpu.vector_store %arg3[%c0_41, %c0_42, %c0_43, %c0_44], %106 {strides = array<i32>} : memref<1x4x8x256xbf16, #tpu.memory_space<vmem>>, vector<1x4x8x256xbf16>,
    return
  }
  func.func @transform_0(%arg0: i32) -> (i32, i32, i32) {
    %c0_i32 = arith.constant 0 : i32
    %c0_i32_0 = arith.constant 0 : i32
    %c0_i32_1 = arith.constant 0 : i32
    return %arg0, %c0_i32, %c0_i32_0 : i32, i32, i32
  }
  func.func @transform_1(%arg0: i32) -> (i32, i32) {
    %c0_i32 = arith.constant 0 : i32
    %c0_i32_0 = arith.constant 0 : i32
    %c0_i32_1 = arith.constant 0 : i32
    return %c0_i32, %c0_i32_0 : i32, i32
  }
  func.func @transform_2(%arg0: i32) -> (i32, i32, i32, i32) {
    %c0_i32 = arith.constant 0 : i32
    %c0_i32_0 = arith.constant 0 : i32
    %c0_i32_1 = arith.constant 0 : i32
    %c0_i32_2 = arith.constant 0 : i32
    return %arg0, %c0_i32, %c0_i32_0, %c0_i32_1 : i32, i32, i32, i32
  }
}

</mosaic_0001>

<bundles_post_ra>
// kernel: _upsample_jit.1
= control target key start
LH: loop header
LB: loop body
LE: loop exit
PB: predicated region body
PF: predicated region fallthrough
CT: control target
= control target key end

     0   :  { %s716_s9 = smov 0   ;;  %s853_s0 = inlined_call_operand.vmem [shape: f32[2,4,256], index: 0, kind: input, shape index: {}]   ;;  %s854_s1 = inlined_call_operand.vmem [shape: bf16[32,36], index: 1, kind: input, shape index: {}]   ;;  %s855_s2 = inlined_call_operand.vmem [shape: bf16[2,4,8,256], index: 2, kind: output, shape index: {}]  }
   0x1 LB: > { %s574_s10 = sadd.s32 4294967295, %s691_s9   ;;  %p578_p0 = scmp.ge.s32.totalorder %s691_s9, 1  ;;  %s691_s9 = sphi %s716_s9, %s12_s9  }
   0x2   : > { %p112_p1 = scmp.lt.s32.totalorder %s691_s9, 3 }
   0x4   : > { %p113_p2 = pnand %p578_p0, %p112_p1 }
   0x5   : > { %p134_p3 = scmp.lt.s32.totalorder (!%p113_p2), %s574_s10, 1  ;;  %s693_s15 = smov (!%p113_p2), 16  }
   0x6   : > { %116 = sbr.rel (%p113_p2) target bundleno = 546 (0x222), region = 28  ;;  %s694_s16 = smov (!%p113_p2), 112  }
   0x7   : > { %s695_s17 = smov (!%p113_p2), 1   ;;  %s696_s18 = smov (!%p113_p2), 111  }
   0x8   : > { %s697_s19 = smov (!%p113_p2), 113   ;;  %s698_s20 = smov (!%p113_p2), 127  }
   0x9   : > { %s699_s21 = smov (!%p113_p2), 15   ;;  %s700_s22 = smov (!%p113_p2), 17  }
   0xb   : > { %s867_s10 = smov (!%p134_p3, %s574_s10), 1  ;;  %v146_v27 = vlaneseq  ;;  %v615_v59 = vld [vmem:[%s854_s1] sm:$0xff] }
   0xc   : > { %s613_s11 = sshll.u32 %s867_s10, 3  ;;  %s614_s27 = sshll.u32 %s867_s10, 5 }
   0xd   : > { %s138_s14 = scalar_lea.vmem %s853_s0, %s613_s11  ;;  %v734_v28 = vand.u32 127, %v146_v27  ;;  %s143_s30 = scalar_lea.vmem %s855_s2, %s614_s27 }
   0xe   : > { %v145_v0 = vld [vmem:[%s138_s14] sm:$0xff] }
   0xf   : > { %182 = vst [vmem:[#allocation1] ss:$2 sm:$0xff] %v145_v0  ;;  %vm209_vm0 = vcmp.lt.s32.totalorder %v734_v28, 16  ;;  %vm173_vm1 = vcmp.ge.s32.totalorder %v734_v28, 16  ;;  %v148_v34 = vadd.s32 128, %v734_v28  ;;  %v153_v38 = vand.u32 15, %v734_v28 }
  0x10   : > { %vm246_vm2 = vcmp.lt.s32.totalorder %v734_v28, 1  ;;  %vm309_vm5 = vcmp.lt.s32.totalorder %v734_v28, 112  ;;  %vm328_vm9 = vcmp.lt.s32.totalorder %v734_v28, 111  ;;  %vm291_vm11 = vcmp.lt.s32.totalorder %v734_v28, 113 }
  0x11   : > { %v160_v39 = vand.u32 15, %v148_v34  ;;  %vm745_vm3 = vcmp.ge.s32.totalorder %v153_v38, 1  ;;  %vm176_vm6 = vcmp.le.s32.totalorder %v148_v34, 239  ;;  %vm763_vm8 = vcmp.le.s32.totalorder %v153_v38, 14 }
  0x12   : > { %vm272_vm13 = vcmp.lt.s32.totalorder %v734_v28, 127  ;;  %vm228_vm14 = vcmp.lt.s32.totalorder %v734_v28, 15  ;;  %vm231_vm15 = vmand %vm173_vm1, %vm763_vm8 }
  0x13   : > { %vm749_vm4 = vcmp.ge.s32.totalorder %v160_v39, 1  ;;  %vm759_vm7 = vcmp.le.s32.totalorder %v160_v39, 14 }
  0x14   : > { %vm771_vm10 = vmand %vm176_vm6, %vm759_vm7 }
  0x15   : > { %vm295_vm12 = vmand %vm176_vm6, %vm749_vm4 }
  0x16   : > { %v183_v1 = vld.sshfl [vmem:[#allocation1] sm:$0xff pattern:$0x75316420]  ;;  %v184_v2 = vld.sshfl [vmem:[#allocation1 + $0x8] sm:$0xff pattern:$0x75316420] }
  0x17   : > { %200 = vst [vmem:[#allocation1] ss:$2 sm:$0xff] %v145_v0  ;;  %v673_v13 = vpack.i.bf16 %v184_v2, %v183_v1 }
  0x1e   : > { %v201_v3 = vld.sshfl [vmem:[#allocation1] sm:$0xff pattern:$0x75316420]  ;;  %v202_v4 = vld.sshfl [vmem:[#allocation1 + $0x8] sm:$0xff pattern:$0x75316420] }
  0x1f   : > { %219 = vst [vmem:[#allocation1] ss:$2 sm:$0xff] %v145_v0  ;;  %v663_v16 = vpack.i.bf16 %v202_v4, %v201_v3 }
  0x21   : > { %664 = vrot.lane.b32.xlu2 %v663_v16, %s693_s15 }
  0x26   : > { %v220_v5 = vld.sshfl [vmem:[#allocation1] sm:$0xff pattern:$0x75316420]  ;;  %v221_v6 = vld.sshfl [vmem:[#allocation1 + $0x8] sm:$0xff pattern:$0x75316420] }
  0x27   : > { %237 = vst [vmem:[#allocation1] ss:$2 sm:$0xff] %v145_v0  ;;  %v678_v26 = vpack.i.bf16 %v221_v6, %v220_v5 }
  0x2e   : > { %v238_v7 = vld.sshfl [vmem:[#allocation1] sm:$0xff pattern:$0x75316420]  ;;  %v239_v8 = vld.sshfl [vmem:[#allocation1 + $0x8] sm:$0xff pattern:$0x75316420] }
  0x2f   : > { %256 = vst [vmem:[#allocation1] ss:$2 sm:$0xff] %v145_v0  ;;  %v668_v20 = vpack.i.bf16 %v239_v8, %v238_v7 }
  0x31   : > { %669 = vrot.lane.b32.xlu2 %v668_v20, %s695_s17 }
  0x36   : > { %v730_v9 = vld.sshfl [vmem:[#allocation1] sm:$0xff pattern:$0x75316420]  ;;  %v732_v10 = vld.sshfl [vmem:[#allocation1 + $0x8] sm:$0xff pattern:$0x75316420] }
  0x37   : > { %263 = vst [vmem:[#allocation1] ss:$2 sm:$0xff] %v145_v0  ;;  %v261_v43 = vpack.c.bf16 %v732_v10, %v730_v9 }
  0x39   : > { %262 = vst [vmem:[#allocation2 + $0x10] sm:$0x33] %v261_v43 }
  0x3e   : > { %v264_v11 = vld.sshfl [vmem:[#allocation1] sm:$0xff pattern:$0x75316420]  ;;  %v265_v12 = vld.sshfl [vmem:[#allocation1 + $0x8] sm:$0xff pattern:$0x75316420] }
  0x3f   : > { %282 = vst [vmem:[#allocation1] ss:$2 sm:$0xff] %v145_v0  ;;  %v648_v25 = vpack.i.bf16 %v265_v12, %v264_v11 }
  0x46   : > { %v283_v14 = vld.sshfl [vmem:[#allocation1] sm:$0xff pattern:$0x75316420]  ;;  %v284_v15 = vld.sshfl [vmem:[#allocation1 + $0x8] sm:$0xff pattern:$0x75316420] }
  0x47   : > { %300 = vst [vmem:[#allocation1] ss:$2 sm:$0xff] %v145_v0  ;;  %v658_v21 = vpack.i.bf16 %v284_v15, %v283_v14 }
  0x4e   : > { %v301_v17 = vld.sshfl [vmem:[#allocation1] sm:$0xff pattern:$0x75316420]  ;;  %v302_v18 = vld.sshfl [vmem:[#allocation1 + $0x8] sm:$0xff pattern:$0x75316420] }
  0x4f   : > { %v653_v19 = vpack.i.bf16 %v302_v18, %v301_v17  ;;  %319 = vst [vmem:[#allocation1] ss:$2 sm:$0xff] %v145_v0 }
  0x51   : > { %654 = vrot.lane.b32.xlu1 %v653_v19, %s694_s16 }
  0x56   : > { %v320_v22 = vld.sshfl [vmem:[#allocation1] sm:$0xff pattern:$0x75316420]  ;;  %v321_v23 = vld.sshfl [vmem:[#allocation1 + $0x8] sm:$0xff pattern:$0x75316420] }
  0x57   : > { %v643_v24 = vpack.i.bf16 %v321_v23, %v320_v22 }
  0x59   : > { %644 = vrot.lane.b32.xlu0 %v643_v24, %s696_s18  ;;  %659 = vrot.lane.b32.xlu1 %v658_v21, %s697_s19 }
  0x61   : > { %649 = vrot.lane.b32.xlu0 %v648_v25, %s698_s20  ;;  %679 = vrot.lane.b32.xlu1 %v678_v26, %s699_s21 }
  0x69   : > { %674 = vrot.lane.b32.xlu0 %v673_v13, %s700_s22 }
  0x7b   : > { %v665_v29 = vpop.permute.xlu2 %664 }
  0x7c   : > { %v667_v30 = vunpack.i.h.bf16 %v665_v29  ;;  %v666_v31 = vunpack.i.l.bf16 %v665_v29 }
  0x7e   : > { %v210_v32 = vsel %vm209_vm0, %v666_v31, %v667_v30  ;;  %v211_v33 = vsel %vm209_vm0, %v667_v30, %v666_v31  ;;  %vm191_vm0 = vcmp.lt.s32.totalorder %v734_v28, 17 }
  0x7f   : > { %v212_v35 = vsel %vm173_vm1, %v211_v33, 0.0 }
  0x80   : > { %v214_v36 = vpack.c.bf16 %v210_v32, %v212_v35 }
  0x82   : > { %v216_v37 = vrot.slane %v214_v36, 6 }
  0x84   : > { %218 = vst [vmem:[#allocation2] sm:$0xcc] %v216_v37 }
  0x8b   : > { %v670_v40 = vpop.permute.xlu2 %669 }
  0x8c   : > { %v672_v41 = vunpack.i.h.bf16 %v670_v40  ;;  %v671_v42 = vunpack.i.l.bf16 %v670_v40 }
  0x8e   : > { %v247_v46 = vsel %vm246_vm2, %v671_v42, %v672_v41  ;;  %v248_v47 = vsel %vm246_vm2, %v672_v41, %v671_v42  ;;  %vm388_vm2 = vcmask 1041408  }
  0x8f   : > { %v249_v48 = vsel %vm745_vm3, %v248_v47, 0.0  ;;  %v250_v49 = vsel %vm749_vm4, %v247_v46, 0.0 }
  0x90   : > { %v251_v50 = vpack.c.bf16 %v250_v49, %v249_v48 }
  0x92   : > { %v253_v51 = vrot.slane %v251_v50, 6 }
  0x94   : > { %255 = vst [vmem:[#allocation2 + $0x8] sm:$0xcc] %v253_v51 }
  0xc3   : > { %v655_v52 = vpop.permute.xlu1 %654 }
  0xc4   : > { %v657_v53 = vunpack.i.h.bf16 %v655_v52  ;;  %v656_v54 = vunpack.i.l.bf16 %v655_v52 }
  0xc6   : > { %v310_v55 = vsel %vm309_vm5, %v656_v54, %v657_v53  ;;  %v311_v56 = vsel %vm309_vm5, %v657_v53, %v656_v54  ;;  %vm194_vm5 = vmand %vm173_vm1, %vm745_vm3  ;;  %vm381_vm1 = vcmask 293888  }
  0xc7   : > { %v313_v57 = vsel %vm176_vm6, %v311_v56, 0.0 }
  0xc8   : > { %v314_v58 = vpack.c.bf16 %v313_v57, %v310_v55 }
  0xca   : > { %v316_v60 = vrot.slane %v314_v58, 6 }
  0xcb   : > { %v645_v63 = vpop.permute.xlu0 %644  ;;  %v660_v0 = vpop.permute.xlu1 %659 }
  0xcc   : > { %318 = vst [vmem:[#allocation2 + $0x18] sm:$0xcc] %v316_v60  ;;  %v647_v1 = vunpack.i.h.bf16 %v645_v63  ;;  %v646_v2 = vunpack.i.l.bf16 %v645_v63  ;;  %v662_v3 = vunpack.i.h.bf16 %v660_v0  ;;  %v661_v4 = vunpack.i.l.bf16 %v660_v0  ;;  %v616_v60 = vld [vmem:[%s854_s1 + $0x8] sm:$0xff] }
  0xce   : > { %v329_v5 = vsel %vm328_vm9, %v646_v2, %v647_v1  ;;  %v330_v6 = vsel %vm328_vm9, %v647_v1, %v646_v2  ;;  %v292_v7 = vsel %vm291_vm11, %v661_v4, %v662_v3  ;;  %v293_v8 = vsel %vm291_vm11, %v662_v3, %v661_v4 }
  0xcf   : > { %v333_v9 = vsel %vm763_vm8, %v329_v5, 0.0  ;;  %v334_v10 = vsel %vm771_vm10, %v330_v6, 0.0  ;;  %v296_v11 = vsel %vm745_vm3, %v292_v7, 0.0  ;;  %v297_v12 = vsel %vm295_vm12, %v293_v8, 0.0 }
  0xd0   : > { %v335_v13 = vpack.c.bf16 %v334_v10, %v333_v9  ;;  %v298_v14 = vpack.c.bf16 %v297_v12, %v296_v11 }
  0xd2   : > { %336 = vst [vmem:[#allocation2 + $0x20] sm:$0x33] %v335_v13 }
  0xd3   : > { %299 = vst [vmem:[#allocation2 + $0x18] sm:$0x33] %v298_v14  ;;  %v650_v15 = vpop.permute.xlu0 %649  ;;  %v680_v16 = vpop.permute.xlu1 %679 }
  0xd4   : > { %v652_v17 = vunpack.i.h.bf16 %v650_v15  ;;  %v651_v18 = vunpack.i.l.bf16 %v650_v15  ;;  %v682_v19 = vunpack.i.h.bf16 %v680_v16  ;;  %v681_v20 = vunpack.i.l.bf16 %v680_v16 }
  0xd6   : > { %v273_v21 = vsel %vm272_vm13, %v651_v18, %v652_v17  ;;  %v274_v22 = vsel %vm272_vm13, %v652_v17, %v651_v18  ;;  %v229_v23 = vsel %vm228_vm14, %v681_v20, %v682_v19  ;;  %v230_v24 = vsel %vm228_vm14, %v682_v19, %v681_v20 }
  0xd7   : > { %v275_v25 = vsel %vm763_vm8, %v273_v21, 0.0  ;;  %v276_v26 = vsel %vm759_vm7, %v274_v22, 0.0  ;;  %v233_v27 = vsel %vm231_vm15, %v230_v24, 0.0  ;;  %v234_v29 = vsel %vm759_vm7, %v229_v23, 0.0 }
  0xd8   : > { %v277_v30 = vpack.c.bf16 %v276_v26, %v275_v25  ;;  %v235_v31 = vpack.c.bf16 %v234_v29, %v233_v27 }
  0xd9   : > { %v345_v32 = vld [vmem:[#allocation2 + $0x20] sm:$0x33] }
  0xda   : > { %v279_v33 = vrot.slane %v277_v30, 6  ;;  %236 = vst [vmem:[#allocation2 + $0x8] sm:$0x33] %v235_v31  ;;  %v369_v34 = vunpack.c.l.b16 %v345_v32  ;;  %v370_v35 = vunpack.c.h.b16 %v345_v32  ;;  %v620_v28 = vld [vmem:[#allocation2 + $0x14] sm:$0xf0] }
  0xdb   : > { %v675_v36 = vpop.permute.xlu0 %674  ;;  %v603_v51 = vld [vmem:[#allocation2 + $0x18] sm:$0xf0] }
  0xdc   : > { %281 = vst [vmem:[#allocation2 + $0x10] sm:$0xcc] %v279_v33  ;;  %v677_v37 = vunpack.i.h.bf16 %v675_v36  ;;  %v676_v38 = vunpack.i.l.bf16 %v675_v36  ;;  %v375_v39 = vpack.c.b16 %v369_v34, %v369_v34  ;;  %v376_v40 = vpack.c.b16 %v370_v35, %v370_v35 }
  0xde   : > { %v192_v41 = vsel %vm191_vm0, %v676_v38, %v677_v37  ;;  %v193_v42 = vsel %vm191_vm0, %v677_v37, %v676_v38  ;;  %v390_v43 = vsel %vm388_vm2, %v375_v39, 0  ;;  %v393_v46 = vsel %vm388_vm2, %v376_v40, 0 }
  0xdf   : > { %v196_v47 = vsel %vm194_vm5, %v193_v42, 0.0  ;;  %v197_v48 = vsel %vm749_vm4, %v192_v41, 0.0  ;;  %400 = vmatpush.bf16.msra.mxu0 %v390_v43  ;;  %621 = vmatpush.bf16.msra.mxu2 %v390_v43 }
  0xe0   : > { %v198_v49 = vpack.c.bf16 %v197_v48, %v196_v47  ;;  %419 = vmatpush.bf16.msra.mxu1 %v393_v46  ;;  %624 = vmatpush.bf16.msra.mxu3 %v393_v46 }
  0xe1   : > { %v618_v54 = vld [vmem:[#allocation2 + $0x4] sm:$0xf0]  ;;  %v595_v55 = vld [vmem:[#allocation2 + $0x8] sm:$0xf0] }
  0xe2   : > { %199 = vst [vmem:[#allocation2] sm:$0x33] %v198_v49 }
  0xe3   : > { %v601_v44 = vld [vmem:[#allocation2 + $0x10] sm:$0xf]  ;;  %v619_v50 = vld [vmem:[#allocation2 + $0x14] sm:$0xf] }
  0xe4   : > { %v602_v52 = vor.u32 %v620_v28, %v601_v44  ;;  %v606_v53 = vor.u32 %v619_v50, %v603_v51 }
  0xe6   : > { %401 = vmatpush.bf16.msra.mxu0 %v602_v52  ;;  %622 = vmatpush.bf16.msra.mxu2 %v602_v52 }
  0xe7   : > { %420 = vmatpush.bf16.msra.mxu1 %v606_v53  ;;  %625 = vmatpush.bf16.msra.mxu3 %v606_v53 }
  0xe9   : > { %v593_v45 = vld [vmem:[#allocation2] sm:$0xf]  ;;  %v617_v56 = vld [vmem:[#allocation2 + $0x4] sm:$0xf] }
  0xea   : > { %v594_v57 = vor.u32 %v618_v54, %v593_v45  ;;  %v598_v58 = vor.u32 %v617_v56, %v595_v55 }
  0xec   : > { %402 = vmatpush.bf16.msra.mxu0 %v594_v57  ;;  %623 = vmatpush.bf16.msra.mxu2 %v594_v57 }
  0xed   : > { %421 = vmatpush.bf16.msra.mxu1 %v598_v58  ;;  %626 = vmatpush.bf16.msra.mxu3 %v598_v58 }
  0xef   : > { %607 = vmatmul.msk.bf16.vlgmr.msra.gmra.mxu0 %vm381_vm1, %v615_v59  ;;  %608 = vmatmul.msk.bf16.vlgmr.msra.gmra.mxu2 %vm381_vm1, %v616_v60 }
  0xf0   : > { %609 = vmatmul.msk.bf16.vlgmr.msra.gmra.mxu1 %vm381_vm1, %v615_v59  ;;  %610 = vmatmul.msk.bf16.vlgmr.msra.gmra.mxu3 %vm381_vm1, %v616_v60 }
 0x16c   : > { %v810_v61 = vpop.f32.mrf.mxu0 }
 0x16d   : > { %v812_v62 = vpop.f32.mrf.mxu1  ;;  %v448_v1 = vmul.f32 %v810_v61, %v810_v61 }
 0x16e   : > { %v433_v63 = vadd.f32 %v812_v62, %v810_v61  ;;  %v449_v2 = vmul.f32 %v812_v62, %v812_v62 }
 0x170   : > { %434 = vadd.xlane.f32.xlu2 %v433_v63  ;;  %v456_v7 = vadd.f32 %v449_v2, %v448_v1 }
 0x172   : > { %v816_v0 = vpop.f32.mrf.mxu2 }
 0x173   : > { %v822_v3 = vpop.f32.mrf.mxu3  ;;  %v452_v9 = vmul.f32 %v816_v0, %v816_v0 }
 0x174   : > { %v824_v4 = vpop.f32.mrf.mxu0  ;;  %v439_v5 = vadd.f32 %v822_v3, %v816_v0  ;;  %v453_v10 = vmul.f32 %v822_v3, %v822_v3 }
 0x175   : > { %v828_v6 = vpop.f32.mrf.mxu1  ;;  %v450_v11 = vmul.f32 %v824_v4, %v824_v4 }
 0x176   : > { %440 = vadd.xlane.f32.xlu1 %v439_v5  ;;  %v436_v8 = vadd.f32 %v828_v6, %v824_v4  ;;  %v451_v12 = vmul.f32 %v828_v6, %v828_v6  ;;  %v462_v13 = vadd.f32 %v453_v10, %v452_v9 }
 0x178   : > { %457 = vadd.xlane.f32.xlu2 %v456_v7  ;;  %437 = vadd.xlane.f32.xlu0 %v436_v8  ;;  %v459_v16 = vadd.f32 %v451_v12, %v450_v11 }
 0x17a   : > { %v411_v14 = vpop.f32.mrf.mxu2 }
 0x17b   : > { %v430_v15 = vpop.f32.mrf.mxu3  ;;  %v454_v18 = vmul.f32 %v411_v14, %v411_v14 }
 0x17c   : > { %v442_v17 = vadd.f32 %v430_v15, %v411_v14  ;;  %v455_v19 = vmul.f32 %v430_v15, %v430_v15 }
 0x17e   : > { %463 = vadd.xlane.f32.xlu1 %v462_v13  ;;  %v465_v20 = vadd.f32 %v455_v19, %v454_v18 }
 0x180   : > { %460 = vadd.xlane.f32.xlu2 %v459_v16  ;;  %443 = vadd.xlane.f32.xlu0 %v442_v17 }
 0x188   : > { %466 = vadd.xlane.f32.xlu2 %v465_v20 }
 0x1e3   : > { %v435_v21 = vpop.xlane.xlu2 %434 }
 0x1e9   : > { %v441_v24 = vpop.xlane.xlu1 %440 }
 0x1eb   : > { %v458_v22 = vpop.xlane.xlu2 %457  ;;  %v438_v23 = vpop.xlane.xlu0 %437 }
 0x1ec   : > { %v445_v25 = vadd.f32 %v438_v23, %v435_v21 }
 0x1ee   : > { %v446_v29 = vadd.f32 %v445_v25, %v441_v24 }
 0x1f1   : > { %v464_v32 = vpop.xlane.xlu1 %463 }
 0x1f3   : > { %v461_v26 = vpop.xlane.xlu2 %460  ;;  %v444_v27 = vpop.xlane.xlu0 %443 }
 0x1f4   : > { %v468_v30 = vadd.f32 %v461_v26, %v458_v22  ;;  %v447_v31 = vadd.f32 %v446_v29, %v444_v27 }
 0x1f6   : > { %v471_v33 = vmul.f32 0.0009765625, %v447_v31  ;;  %v469_v34 = vadd.f32 %v468_v30, %v464_v32 }
 0x1f8   : > { %v473_v38 = vmul.f32 %v471_v33, %v471_v33  ;;  %v487_v28 = vsub.f32 %v810_v61, %v471_v33  ;;  %v488_v44 = vsub.f32 %v812_v62, %v471_v33  ;;  %v489_v50 = vsub.f32 %v824_v4, %v471_v33 }
 0x1f9   : > { %v490_v51 = vsub.f32 %v828_v6, %v471_v33  ;;  %v491_v52 = vsub.f32 %v816_v0, %v471_v33  ;;  %v492_v54 = vsub.f32 %v822_v3, %v471_v33  ;;  %v493_v55 = vsub.f32 %v411_v14, %v471_v33 }
 0x1fa   : > { %v494_v45 = vsub.f32 %v430_v15, %v471_v33 }
 0x1fb   : > { %v467_v35 = vpop.xlane.xlu2 %466 }
 0x1fc   : > { %v470_v36 = vadd.f32 %v469_v34, %v467_v35 }
 0x1fe   : > { %v472_v37 = vmul.f32 0.0009765625, %v470_v36 }
 0x200   : > { %v474_v39 = vsub.f32 %v472_v37, %v473_v38 }
 0x202   : > { %v475_v40 = vmax.f32 %v474_v39, 0.0 }
 0x204   : > { %v476_v41 = vadd.f32 1e-05, %v475_v40 }
 0x206   : > { %683 = vrsqrt.f32 %v476_v41  ;;  %vm483_vm4 = vweird.f32 %v476_v41 }
 0x20c   : > { %v684_v42 = vpop.eup %683 }
 0x20d   : > { %v478_v43 = vmul.f32 %v684_v42, %v476_v41  ;;  %vm484_vm3 = vweird.f32 %v684_v42 }
 0x20e   : > { %vm485_vm6 = vmor %vm483_vm4, %vm484_vm3 }
 0x20f   : > { %v479_v46 = vmul.f32 %v684_v42, %v478_v43 }
 0x211   : > { %v480_v47 = vmul.f32 0.5, %v479_v46 }
 0x213   : > { %v481_v48 = vsub.f32 1.5, %v480_v47 }
 0x215   : > { %v482_v49 = vmul.f32 %v684_v42, %v481_v48 }
 0x217   : > { %v486_v53 = vsel %vm485_vm6, %v684_v42, %v482_v49 }
 0x218   : > { %v495_v56 = vmul.f32 %v487_v28, %v486_v53  ;;  %v496_v57 = vmul.f32 %v488_v44, %v486_v53  ;;  %v497_v58 = vmul.f32 %v489_v50, %v486_v53  ;;  %v498_v59 = vmul.f32 %v490_v51, %v486_v53 }
 0x219   : > { %v499_v60 = vmul.f32 %v491_v52, %v486_v53  ;;  %v500_v61 = vmul.f32 %v492_v54, %v486_v53  ;;  %v501_v63 = vmul.f32 %v493_v55, %v486_v53  ;;  %v502_v62 = vmul.f32 %v494_v45, %v486_v53 }
 0x21a   : > { %v503_v1 = vmax.f32 %v495_v56, 0.0  ;;  %v504_v2 = vmax.f32 %v496_v57, 0.0  ;;  %v505_v4 = vmax.f32 %v497_v58, 0.0  ;;  %v506_v5 = vmax.f32 %v498_v59, 0.0 }
 0x21b   : > { %v507_v0 = vmax.f32 %v499_v60, 0.0  ;;  %v508_v3 = vmax.f32 %v500_v61, 0.0  ;;  %v509_v6 = vmax.f32 %v501_v63, 0.0  ;;  %v510_v7 = vmax.f32 %v502_v62, 0.0 }
 0x21c   : > { %v511_v8 = vpack.c.bf16 %v504_v2, %v503_v1  ;;  %v512_v9 = vpack.c.bf16 %v506_v5, %v505_v4 }
 0x21d   : > { %v513_v10 = vpack.c.bf16 %v508_v3, %v507_v0  ;;  %v514_v11 = vpack.c.bf16 %v510_v7, %v509_v6 }
 0x21e   : > { %515 = vst [vmem:[%s143_s30] sm:$0xff] %v511_v8 }
 0x21f   : > { %516 = vst [vmem:[%s143_s30 + $0x8] sm:$0xff] %v512_v9 }
 0x220   : > { %517 = vst [vmem:[%s143_s30 + $0x10] sm:$0xff] %v513_v10 }
 0x221   : > { %518 = vst [vmem:[%s143_s30 + $0x18] sm:$0xff] %v514_v11 }
 0x222 PF: > { %s12_s9 = sadd.s32 1, %s691_s9  }
 0x223   : > { %p9_p4 = scmp.ge.s32.totalorder %s12_s9, 4  }
 0x225   :  { %11 = sbr.rel (!%p9_p4) target bundleno = 1 (0x1), region = 58 }

</bundles_post_ra>
